<compile_context>
chip_gen: v6e
topology: v6e:2x2x1
jax: 0.10.0
libtpu: 0.0.40
codegen_flags: <defaults>
</compile_context>

<pallas_src>
import functools

import jax
import jax.numpy as jnp
from jax import lax
from jax.experimental import pallas as pl
from jax.experimental.pallas import tpu as pltpu


def _classifier_kernel(seed_ref, x_ref, w1_ref, b1_ref, w2_ref, b2_ref, o_ref,
                       *, drop_p: float, training: bool):
    # ---- layer1: x @ W1^T + b1 (MXU, bf16 inputs, f32 accumulate) ----
    x = x_ref[...]                               # (TB, Din)  bf16
    w1 = w1_ref[...]                             # (H, Din)   bf16, torch (out,in)
    h = lax.dot_general(x, w1,
                        dimension_numbers=(((1,), (1,)), ((), ())),
                        preferred_element_type=jnp.float32)
    h = h + b1_ref[...]                          # (1, H) f32 broadcast

    # ---- exact (erf-based) GELU, matching torch.nn.functional.gelu default ----
    inv_sqrt2 = jnp.float32(0.7071067811865476)
    h = jnp.float32(0.5) * h * (jnp.float32(1.0) + lax.erf(h * inv_sqrt2))

    # ---- dropout (training mode), portable counter-based hash PRNG ----
    if training and drop_p > 0.0:
        tb, hdim = h.shape
        rows = lax.broadcasted_iota(jnp.int32, h.shape, 0) + pl.program_id(0) * tb
        cols = lax.broadcasted_iota(jnp.int32, h.shape, 1)
        # unique counter per (global row, hidden unit); hash with murmur3 fmix32
        z = (rows * hdim + cols).astype(jnp.uint32)
        z = z * jnp.uint32(0x9E3779B1) + seed_ref[0].astype(jnp.uint32)
        z = z ^ (z >> jnp.uint32(16))
        z = z * jnp.uint32(0x85EBCA6B)
        z = z ^ (z >> jnp.uint32(13))
        z = z * jnp.uint32(0xC2B2AE35)
        z = z ^ (z >> jnp.uint32(16))
        # top-ish 24 bits -> uniform float in [0, 1)
        rbits = (z >> jnp.uint32(8)).astype(jnp.int32)          # [0, 2^24)
        r = rbits.astype(jnp.float32) * jnp.float32(1.0 / 16777216.0)
        keep = r >= jnp.float32(drop_p)
        scale = jnp.float32(1.0 / (1.0 - drop_p))
        h = jnp.where(keep, h, jnp.float32(0.0)) * scale

    # ---- layer2: h @ W2^T + b2 (MXU) ----
    h_b = h.astype(jnp.bfloat16)
    w2 = w2_ref[...]                             # (Dout, H) bf16, torch (out,in)
    out = lax.dot_general(h_b, w2,
                          dimension_numbers=(((1,), (1,)), ((), ())),
                          preferred_element_type=jnp.float32)
    out = out + b2_ref[...]

    # ---- sigmoid ----
    o_ref[...] = jax.nn.sigmoid(out)


def _pick_batch_tile(B: int) -> int:
    """Largest batch tile that divides B; single block for small batches."""
    if B <= 256:
        return B
    for tb in (256, 128, 64, 32, 16, 8):
        if B % tb == 0:
            return tb
    return B


def classifier_forward(x, w1, b1, w2, b2, *, drop_p=0.2, seed=0, training=True):
    """Forward pass of the Classifier.

    Args:
      x:  (B, input_dim)
      w1: (512, input_dim)   -- torch Linear layout (out, in), NOT transposed
      b1: (512,)
      w2: (output_dim, 512)  -- torch Linear layout (out, in), NOT transposed
      b2: (output_dim,)
    Returns:
      (B, output_dim) float32 in (0, 1)
    """
    B, Din = x.shape
    H, Din2 = w1.shape
    Dout, H2 = w2.shape
    assert Din == Din2 and H == H2

    # bf16 MXU inputs (halves weight DMA bytes); biases stay f32.
    x_b = jnp.asarray(x, jnp.bfloat16)
    w1_b = jnp.asarray(w1, jnp.bfloat16)          # (H, Din)
    w2_b = jnp.asarray(w2, jnp.bfloat16)          # (Dout, H)
    b1_2d = jnp.asarray(b1, jnp.float32).reshape(1, H)
    b2_2d = jnp.asarray(b2, jnp.float32).reshape(1, Dout)
    seed_arr = jnp.asarray([seed], dtype=jnp.int32)

    tb = _pick_batch_tile(B)
    num_tiles = B // tb

    kernel = functools.partial(_classifier_kernel,
                               drop_p=float(drop_p), training=bool(training))

    return pl.pallas_call(
        kernel,
        out_shape=jax.ShapeDtypeStruct((B, Dout), jnp.float32),
        grid_spec=pltpu.PrefetchScalarGridSpec(
            num_scalar_prefetch=1,                     # seed lives in SMEM
            grid=(num_tiles,),                         # batch tiling
            in_specs=[
                pl.BlockSpec((tb, Din),  lambda i, seed: (i, 0)),   # x tile
                pl.BlockSpec((H, Din),   lambda i, seed: (0, 0)),   # W1 resident
                pl.BlockSpec((1, H),     lambda i, seed: (0, 0)),   # b1 resident
                pl.BlockSpec((Dout, H),  lambda i, seed: (0, 0)),   # W2 resident
                pl.BlockSpec((1, Dout),  lambda i, seed: (0, 0)),   # b2 resident
            ],
            out_specs=pl.BlockSpec((tb, Dout), lambda i, seed: (i, 0)),
        ),
        compiler_params=pltpu.CompilerParams(
            dimension_semantics=("parallel",)),        # both TCs on v7x if B large
    )(seed_arr, x_b, w1_b, b1_2d, w2_b, b2_2d)


def _reference_eval(x, w1, b1, w2, b2):
    """Pure-JAX f32 reference (no dropout), for a sanity comparison."""
    h = x @ w1.T + b1
    h = 0.5 * h * (1.0 + lax.erf(h * 0.7071067811865476))
    out = h @ w2.T + b2
    return jax.nn.sigmoid(out)


if __name__ == "__main__":
    # Shapes consistent with the module: batch=8, input_dim=32,
    # hidden=512 (fixed by the module), output_dim=16.
    B, INPUT_DIM, HIDDEN, OUTPUT_DIM = 8, 32, 512, 16

    key = jax.random.PRNGKey(0)
    kx, kw1, kb1, kw2, kb2 = jax.random.split(key, 5)

    x = jax.random.normal(kx, (B, INPUT_DIM), dtype=jnp.float32)

    # torch Linear shapes: weight (out, in).
    lim1 = 1.0 / (INPUT_DIM ** 0.5)
    w1 = jax.random.uniform(kw1, (HIDDEN, INPUT_DIM), jnp.float32, -lim1, lim1)
    b1 = jax.random.uniform(kb1, (HIDDEN,), jnp.float32, -lim1, lim1)
    lim2 = 1.0 / (HIDDEN ** 0.5)
    w2 = jax.random.uniform(kw2, (OUTPUT_DIM, HIDDEN), jnp.float32, -lim2, lim2)
    b2 = jax.random.uniform(kb2, (OUTPUT_DIM,), jnp.float32, -lim2, lim2)

    # Training-mode pass (dropout active).
    out = classifier_forward(x, w1, b1, w2, b2, drop_p=0.2, seed=1234,
                             training=True)
    out = jax.block_until_ready(out)
    assert out.shape == (B, OUTPUT_DIM)
    assert bool(jnp.all(jnp.isfinite(out)))
    assert bool(jnp.all((out > 0.0) & (out < 1.0)))

    # Eval-mode pass (dropout off) vs pure-JAX f32 reference.
    out_eval = jax.block_until_ready(
        classifier_forward(x, w1, b1, w2, b2, drop_p=0.2, training=False))
    ref = jax.block_until_ready(_reference_eval(x, w1, b1, w2, b2))
    assert out_eval.shape == (B, OUTPUT_DIM)
    # bf16 MXU inputs with f32 accumulation -> small numeric drift vs f32 ref.
    assert bool(jnp.max(jnp.abs(out_eval - ref)) < 0.03)

    print("KERNEL_OK")
</pallas_src>

<mosaic_0001>
module attributes {stable_mosaic.version = 11 : i64} {
  func.func @_classifier_kernel(%arg0: i32, %arg1: memref<1xi32, #tpu.memory_space<smem>>, %arg2: memref<8x32xbf16, #tpu.memory_space<vmem>>, %arg3: memref<512x32xbf16, #tpu.memory_space<vmem>>, %arg4: memref<1x512xf32, #tpu.memory_space<vmem>>, %arg5: memref<16x512xbf16, #tpu.memory_space<vmem>>, %arg6: memref<1x16xf32, #tpu.memory_space<vmem>>, %arg7: memref<8x16xf32, #tpu.memory_space<vmem>>) attributes {dimension_semantics = [#tpu.dimension_semantics<parallel>], iteration_bounds = array<i64: 1>, scalar_prefetch = 1 : i64, scratch_operands = 0 : i64, tpu.core_type = #tpu.core_type<tc>, window_params = [{transform_indices = @transform_0, window_bounds = array<i64: 8, 32>}, {pipeline_mode = #tpu.pipeline_mode<synchronous>, transform_indices = @transform_1, window_bounds = array<i64: 512, 32>}, {pipeline_mode = #tpu.pipeline_mode<synchronous>, transform_indices = @transform_2, window_bounds = array<i64: 1, 512>}, {pipeline_mode = #tpu.pipeline_mode<synchronous>, transform_indices = @transform_3, window_bounds = array<i64: 16, 512>}, {pipeline_mode = #tpu.pipeline_mode<synchronous>, transform_indices = @transform_4, window_bounds = array<i64: 1, 16>}, {transform_indices = @transform_5, window_bounds = array<i64: 8, 16>}]} {
    %c0 = arith.constant 0 : index
    %c0_0 = arith.constant 0 : index
    %0 = vector.load %arg2[%c0, %c0_0] : memref<8x32xbf16, #tpu.memory_space<vmem>>, vector<8x32xbf16>
    %c0_1 = arith.constant 0 : index
    %c0_2 = arith.constant 0 : index
    %1 = vector.load %arg3[%c0_1, %c0_2] : memref<512x32xbf16, #tpu.memory_space<vmem>>, vector<512x32xbf16>
    %cst = arith.constant dense<0.000000e+00> : vector<8x512xf32>
    %2 = tpu.matmul %0, %1, %cst {dimension_numbers = #tpu.dot_dimension_numbers<[1], [1], [0], [0], [0, 0, 1, 0], [], []>} : vector<8x32xbf16>, vector<512x32xbf16>, vector<8x512xf32> -> vector<8x512xf32>
    %c0_3 = arith.constant 0 : index
    %c0_4 = arith.constant 0 : index
    %3 = vector.load %arg4[%c0_3, %c0_4] : memref<1x512xf32, #tpu.memory_space<vmem>>, vector<1x512xf32>
    %4 = vector.broadcast %3 : vector<1x512xf32> to vector<8x512xf32>
    %5 = arith.addf %2, %4 : vector<8x512xf32>
    %cst_5 = arith.constant 5.000000e-01 : f32
    %6 = vector.broadcast %cst_5 : f32 to vector<8x512xf32>
    %7 = arith.mulf %6, %5 : vector<8x512xf32>
    %cst_6 = arith.constant 0.707106769 : f32
    %8 = vector.broadcast %cst_6 : f32 to vector<8x512xf32>
    %9 = arith.mulf %5, %8 : vector<8x512xf32>
    %10 = math.erf %9 : vector<8x512xf32>
    %cst_7 = arith.constant 1.000000e+00 : f32
    %11 = vector.broadcast %cst_7 : f32 to vector<8x512xf32>
    %12 = arith.addf %11, %10 : vector<8x512xf32>
    %13 = arith.mulf %7, %12 : vector<8x512xf32>
    %14 = tpu.iota {dimensions = array<i32: 0>} : vector<8x512xi32>
    %c8_i32 = arith.constant 8 : i32
    %15 = arith.muli %arg0, %c8_i32 : i32
    %16 = vector.broadcast %15 : i32 to vector<8x512xi32>
    %17 = arith.addi %14, %16 : vector<8x512xi32>
    %18 = tpu.iota {dimensions = array<i32: 1>} : vector<8x512xi32>
    %c512_i32 = arith.constant 512 : i32
    %19 = vector.broadcast %c512_i32 : i32 to vector<8x512xi32>
    %20 = arith.muli %17, %19 : vector<8x512xi32>
    %21 = arith.addi %20, %18 : vector<8x512xi32>
    %c-1640531535_i32 = arith.constant -1640531535 : i32
    %22 = vector.broadcast %c-1640531535_i32 : i32 to vector<8x512xi32>
    %23 = arith.muli %21, %22 : vector<8x512xi32>
    %c0_8 = arith.constant 0 : index
    %24 = memref.load %arg1[%c0_8] : memref<1xi32, #tpu.memory_space<smem>>
    %25 = vector.broadcast %24 : i32 to vector<8x512xi32>
    %26 = arith.addi %23, %25 : vector<8x512xi32>
    %c16_i32 = arith.constant 16 : i32
    %27 = vector.broadcast %c16_i32 : i32 to vector<8x512xi32>
    %28 = arith.shrui %26, %27 : vector<8x512xi32>
    %29 = arith.xori %26, %28 : vector<8x512xi32>
    %c-2048144789_i32 = arith.constant -2048144789 : i32
    %30 = vector.broadcast %c-2048144789_i32 : i32 to vector<8x512xi32>
    %31 = arith.muli %29, %30 : vector<8x512xi32>
    %c13_i32 = arith.constant 13 : i32
    %32 = vector.broadcast %c13_i32 : i32 to vector<8x512xi32>
    %33 = arith.shrui %31, %32 : vector<8x512xi32>
    %34 = arith.xori %31, %33 : vector<8x512xi32>
    %c-1028477387_i32 = arith.constant -1028477387 : i32
    %35 = vector.broadcast %c-1028477387_i32 : i32 to vector<8x512xi32>
    %36 = arith.muli %34, %35 : vector<8x512xi32>
    %c16_i32_9 = arith.constant 16 : i32
    %37 = vector.broadcast %c16_i32_9 : i32 to vector<8x512xi32>
    %38 = arith.shrui %36, %37 : vector<8x512xi32>
    %39 = arith.xori %36, %38 : vector<8x512xi32>
    %c8_i32_10 = arith.constant 8 : i32
    %40 = vector.broadcast %c8_i32_10 : i32 to vector<8x512xi32>
    %41 = arith.shrui %39, %40 : vector<8x512xi32>
    %42 = arith.sitofp %41 : vector<8x512xi32> to vector<8x512xf32>
    %cst_11 = arith.constant 5.96046448E-8 : f32
    %43 = vector.broadcast %cst_11 : f32 to vector<8x512xf32>
    %44 = arith.mulf %42, %43 : vector<8x512xf32>
    %cst_12 = arith.constant 2.000000e-01 : f32
    %45 = vector.broadcast %cst_12 : f32 to vector<8x512xf32>
    %46 = arith.cmpf oge, %44, %45 : vector<8x512xf32>
    %cst_13 = arith.constant 0.000000e+00 : f32
    %47 = vector.broadcast %cst_13 : f32 to vector<8x512xf32>
    %48 = arith.select %46, %13, %47 : vector<8x512xi1>, vector<8x512xf32>
    %cst_14 = arith.constant 1.250000e+00 : f32
    %49 = vector.broadcast %cst_14 : f32 to vector<8x512xf32>
    %50 = arith.mulf %48, %49 : vector<8x512xf32>
    %51 = arith.truncf %50 : vector<8x512xf32> to vector<8x512xbf16>
    %c0_15 = arith.constant 0 : index
    %c0_16 = arith.constant 0 : index
    %52 = vector.load %arg5[%c0_15, %c0_16] : memref<16x512xbf16, #tpu.memory_space<vmem>>, vector<16x512xbf16>
    %cst_17 = arith.constant dense<0.000000e+00> : vector<8x16xf32>
    %53 = tpu.matmul %51, %52, %cst_17 {dimension_numbers = #tpu.dot_dimension_numbers<[1], [1], [0], [0], [0, 0, 1, 0], [], []>} : vector<8x512xbf16>, vector<16x512xbf16>, vector<8x16xf32> -> vector<8x16xf32>
    %c0_18 = arith.constant 0 : index
    %c0_19 = arith.constant 0 : index
    %54 = vector.load %arg6[%c0_18, %c0_19] : memref<1x16xf32, #tpu.memory_space<vmem>>, vector<1x16xf32>
    %55 = vector.broadcast %54 : vector<1x16xf32> to vector<8x16xf32>
    %56 = arith.addf %53, %55 : vector<8x16xf32>
    %57 = arith.negf %56 : vector<8x16xf32>
    %58 = math.exp %57 : vector<8x16xf32>
    %cst_20 = arith.constant 1.000000e+00 : f32
    %59 = vector.broadcast %cst_20 : f32 to vector<8x16xf32>
    %60 = arith.addf %59, %58 : vector<8x16xf32>
    %61 = arith.divf %59, %60 : vector<8x16xf32>
    %c0_21 = arith.constant 0 : index
    %c0_22 = arith.constant 0 : index
    %62 = vector.load %arg7[%c0_21, %c0_22] : memref<8x16xf32, #tpu.memory_space<vmem>>, vector<8x16xf32>
    tpu.vector_store %arg7[%c0_21, %c0_22], %61 {strides = array<i32>} : memref<8x16xf32, #tpu.memory_space<vmem>>, vector<8x16xf32>,
    return
  }
  func.func @transform_0(%arg0: i32, %arg1: memref<1xi32, #tpu.memory_space<smem>>) -> (i32, i32) {
    %c0_i32 = arith.constant 0 : i32
    %c0_i32_0 = arith.constant 0 : i32
    return %arg0, %c0_i32 : i32, i32
  }
  func.func @transform_1(%arg0: i32, %arg1: memref<1xi32, #tpu.memory_space<smem>>) -> (i32, i32) {
    %c0_i32 = arith.constant 0 : i32
    %c0_i32_0 = arith.constant 0 : i32
    %c0_i32_1 = arith.constant 0 : i32
    return %c0_i32, %c0_i32_0 : i32, i32
  }
  func.func @transform_2(%arg0: i32, %arg1: memref<1xi32, #tpu.memory_space<smem>>) -> (i32, i32) {
    %c0_i32 = arith.constant 0 : i32
    %c0_i32_0 = arith.constant 0 : i32
    %c0_i32_1 = arith.constant 0 : i32
    return %c0_i32, %c0_i32_0 : i32, i32
  }
  func.func @transform_3(%arg0: i32, %arg1: memref<1xi32, #tpu.memory_space<smem>>) -> (i32, i32) {
    %c0_i32 = arith.constant 0 : i32
    %c0_i32_0 = arith.constant 0 : i32
    %c0_i32_1 = arith.constant 0 : i32
    return %c0_i32, %c0_i32_0 : i32, i32
  }
  func.func @transform_4(%arg0: i32, %arg1: memref<1xi32, #tpu.memory_space<smem>>) -> (i32, i32) {
    %c0_i32 = arith.constant 0 : i32
    %c0_i32_0 = arith.constant 0 : i32
    %c0_i32_1 = arith.constant 0 : i32
    return %c0_i32, %c0_i32_0 : i32, i32
  }
  func.func @transform_5(%arg0: i32, %arg1: memref<1xi32, #tpu.memory_space<smem>>) -> (i32, i32) {
    %c0_i32 = arith.constant 0 : i32
    %c0_i32_0 = arith.constant 0 : i32
    return %arg0, %c0_i32 : i32, i32
  }
}

</mosaic_0001>

<bundles_post_ra>
// kernel: tpu_custom_call.1
= control target key start
LH: loop header
LB: loop body
LE: loop exit
PB: predicated region body
PF: predicated region fallthrough
CT: control target
= control target key end

     0   :  { %vm271_vm0 = vcmask 261120   ;;  %s1051_s0 = inlined_call_operand.<no memory space> [shape: s32[1], index: 0, kind: input, shape index: {}]   ;;  %s1052_s1 = inlined_call_operand.vmem [shape: bf16[8,32], index: 1, kind: input, shape index: {}]   ;;  %s1053_s2 = inlined_call_operand.vmem [shape: bf16[512,32], index: 2, kind: input, shape index: {}]   ;;  %s1054_s3 = inlined_call_operand.vmem [shape: f32[1,512], index: 3, kind: input, shape index: {}]   ;;  %s1055_s4 = inlined_call_operand.vmem [shape: bf16[16,512], index: 4, kind: input, shape index: {}]   ;;  %s1056_s5 = inlined_call_operand.vmem [shape: f32[1,16], index: 5, kind: input, shape index: {}]   ;;  %s1057_s6 = inlined_call_operand.hbm [shape: f32[8,16], index: 6, kind: output, shape index: {}]  }
   0x1   :  { %v784_v0 = vld [vmem:[%s1053_s2 + $0x78] sm:$0xff]   ;;  %v788_v5 = vld [vmem:[%s1053_s2 + $0x70] sm:$0xff]   ;;  %v792_v11 = vld [vmem:[%s1053_s2 + $0x68] sm:$0xff]  }
   0x2   :  { %v785_v1 = vld [vmem:[%s1053_s2 + $0xf8] sm:$0xff]   ;;  %767 = vmatprep.subr.msk.bf16.mxu0 %vm271_vm0, %v784_v0  ;;  %v789_v7 = vld [vmem:[%s1053_s2 + $0xf0] sm:$0xff]   ;;  %v793_v13 = vld [vmem:[%s1053_s2 + $0xe8] sm:$0xff]  }
   0x3   :  { %v786_v2 = vld [vmem:[%s1053_s2 + $0x38] sm:$0xff]   ;;  %775 = vmatprep.subr.msk.bf16.mxu1 %vm271_vm0, %v785_v1  ;;  %v790_v8 = vld [vmem:[%s1053_s2 + $0x30] sm:$0xff]   ;;  %v794_v14 = vld [vmem:[%s1053_s2 + $0x28] sm:$0xff]  }
   0x4   :  { %v787_v3 = vld [vmem:[%s1053_s2 + $0xb8] sm:$0xff]   ;;  %v297_v4 = vsel %vm271_vm0, %v786_v2, 0  ;;  %v791_v9 = vld [vmem:[%s1053_s2 + $0xb0] sm:$0xff]   ;;  %v294_v10 = vsel %vm271_vm0, %v790_v8, 0  ;;  %v795_v15 = vld [vmem:[%s1053_s2 + $0xa8] sm:$0xff]   ;;  %v291_v16 = vsel %vm271_vm0, %v794_v14, 0 }
   0x5   :  { %732 = vmatpush3.bf16.xpose.msra.mxu0 %v297_v4  ;;  %v345_v6 = vsel %vm271_vm0, %v787_v3, 0  ;;  %v342_v12 = vsel %vm271_vm0, %v791_v9, 0  ;;  %v796_v17 = vld [vmem:[%s1053_s2 + $0x60] sm:$0xff]   ;;  %v339_v18 = vsel %vm271_vm0, %v795_v15, 0  ;;  %v800_v23 = vld [vmem:[%s1053_s2 + $0x58] sm:$0xff]   ;;  %v804_v30 = vld [vmem:[%s1053_s2 + $0x50] sm:$0xff]  }
   0x6   :  { %750 = vmatpush3.bf16.xpose.msra.mxu1 %v345_v6  ;;  %768 = vmatprep.subr.msk.bf16.mxu0 %vm271_vm0, %v788_v5  ;;  %v797_v19 = vld [vmem:[%s1053_s2 + $0xe0] sm:$0xff]   ;;  %v801_v25 = vld [vmem:[%s1053_s2 + $0xd8] sm:$0xff]  }
   0x7   :  { %776 = vmatprep.subr.msk.bf16.mxu1 %vm271_vm0, %v789_v7  ;;  %v798_v20 = vld [vmem:[%s1053_s2 + $0x20] sm:$0xff]   ;;  %v802_v26 = vld [vmem:[%s1053_s2 + $0x18] sm:$0xff]  }
   0x8   :  { %v799_v21 = vld [vmem:[%s1053_s2 + $0xa0] sm:$0xff]   ;;  %v288_v22 = vsel %vm271_vm0, %v798_v20, 0  ;;  %v803_v27 = vld [vmem:[%s1053_s2 + $0x98] sm:$0xff]   ;;  %v285_v29 = vsel %vm271_vm0, %v802_v26, 0 }
   0x9   :  { %v336_v24 = vsel %vm271_vm0, %v799_v21, 0  ;;  %v24_v28 = vld [vmem:[%s1052_s1] sm:$0xf] }
   0xa   :  { %747 = vmatprep.mubr.msk.bf16.mxu0 %vm271_vm0, %v24_v28  ;;  %765 = vmatprep.mubr.msk.bf16.mxu1 %vm271_vm0, %v24_v28 }
   0xd   :  { %734 = vmatpush3.bf16.xpose.msra.mxu0 %v294_v10 }
   0xe   :  { %752 = vmatpush3.bf16.xpose.msra.mxu1 %v342_v12  ;;  %769 = vmatprep.subr.msk.bf16.mxu0 %vm271_vm0, %v792_v11 }
   0xf   :  { %777 = vmatprep.subr.msk.bf16.mxu1 %vm271_vm0, %v793_v13 }
  0x15   :  { %736 = vmatpush3.bf16.xpose.msra.mxu0 %v291_v16 }
  0x16   :  { %754 = vmatpush3.bf16.xpose.msra.mxu1 %v339_v18  ;;  %770 = vmatprep.subr.msk.bf16.mxu0 %vm271_vm0, %v796_v17 }
  0x17   :  { %778 = vmatprep.subr.msk.bf16.mxu1 %vm271_vm0, %v797_v19 }
  0x1d   :  { %738 = vmatpush3.bf16.xpose.msra.mxu0 %v288_v22 }
  0x1e   :  { %756 = vmatpush3.bf16.xpose.msra.mxu1 %v336_v24  ;;  %771 = vmatprep.subr.msk.bf16.mxu0 %vm271_vm0, %v800_v23 }
  0x1f   :  { %779 = vmatprep.subr.msk.bf16.mxu1 %vm271_vm0, %v801_v25 }
  0x20   :  { %12 = vsyncpa [#allocation5], 0  ;;  %v333_v31 = vsel %vm271_vm0, %v803_v27, 0  ;;  %v805_v32 = vld [vmem:[%s1053_s2 + $0xd0] sm:$0xff]   ;;  %v808_v36 = vld [vmem:[%s1053_s2 + $0x48] sm:$0xff]   ;;  %v91_v53 = vlaneseq  ;;  %v493_v1 = vstv %s1051_s0  ;;  %s856_s23 = smov [#allocation4]  }
  0x21   :  { %v806_v33 = vld [vmem:[%s1053_s2 + $0x10] sm:$0xff]   ;;  %v809_v38 = vld [vmem:[%s1053_s2 + $0xc8] sm:$0xff]   ;;  %v812_v42 = vld [vmem:[%s1053_s2 + $0x40] sm:$0xff]   ;;  %s683_s24 = sshll.u32 %s856_s23, 4  ;;  %vm675_vm5 = vcmask 130048   ;;  %s684_s24 = int_to_ptr.vmem [resolvable:$true] %s683_s24 }
  0x22   :  { %v807_v34 = vld [vmem:[%s1053_s2 + $0x90] sm:$0xff]   ;;  %v282_v35 = vsel %vm271_vm0, %v806_v33, 0  ;;  %v810_v39 = vld [vmem:[%s1053_s2 + $0x8] sm:$0xff]   ;;  %v813_v44 = vld [vmem:[%s1053_s2 + $0xc0] sm:$0xff]   ;;  %v92_v54 = vshrl.u32 %v91_v53, 7  ;;  %v479_v55 = vand.u32 127, %v91_v53  ;;  %p839_p1 = scmp.lt.s32.totalorder %s684_s24, %s684_s24 }
  0x23   :  { %v330_v37 = vsel %vm271_vm0, %v807_v34, 0  ;;  %v811_v40 = vld [vmem:[%s1053_s2 + $0x88] sm:$0xff]   ;;  %v279_v41 = vsel %vm271_vm0, %v810_v39, 0  ;;  %v814_v45 = vld [vmem:[%s1053_s2] sm:$0xff]  }
  0x24   :  { %v327_v43 = vsel %vm271_vm0, %v811_v40, 0  ;;  %v815_v46 = vld [vmem:[%s1053_s2 + $0x80] sm:$0xff]   ;;  %v276_v47 = vsel %vm271_vm0, %v814_v45, 0  ;;  %v821_v50 = vld [vmem:[%s1055_s4 + $0xc] ss:$16 sps:$4 sm:$0xff]   ;;  %v483_v56 = vmul.u32 512, %v92_v54 }
  0x25   :  { %740 = vmatpush3.bf16.xpose.msra.mxu0 %v285_v29  ;;  %v324_v48 = vsel %vm271_vm0, %v815_v46, 0  ;;  %v818_v49 = vld [vmem:[%s1055_s4 + $0x4] ss:$16 sps:$4 sm:$0xff]   ;;  %v816_v51 = vld [vmem:[%s1055_s4] ss:$16 sps:$4 sm:$0xff]   ;;  %v481_v57 = vadd.s32 256, %v479_v55 }
  0x26   :  { %758 = vmatpush3.bf16.xpose.msra.mxu1 %v333_v31  ;;  %772 = vmatprep.subr.msk.bf16.mxu0 %vm271_vm0, %v804_v30  ;;  %v819_v52 = vld [vmem:[%s1055_s4 + $0x8] ss:$16 sps:$4 sm:$0xff]   ;;  %v480_v58 = vadd.s32 128, %v479_v55  ;;  %v482_v59 = vadd.s32 384, %v479_v55  ;;  %v484_v60 = vadd.s32 %v483_v56, %v479_v55  ;;  %v93_v26 = vsub.s32 0, %v92_v54 }
  0x27   :  { %780 = vmatprep.subr.msk.bf16.mxu1 %vm271_vm0, %v805_v32  ;;  %v486_v61 = vadd.s32 %v483_v56, %v481_v57  ;;  %v101_v29 = vsub.s32 2, %v92_v54  ;;  %v97_v31 = vsub.s32 1, %v92_v54  ;;  %v105_v34 = vsub.s32 3, %v92_v54 }
  0x28   :  { %v485_v62 = vadd.s32 %v483_v56, %v480_v58  ;;  %v487_v63 = vadd.s32 %v483_v56, %v482_v59  ;;  %v488_v0 = vmul.u32 2654435761, %v484_v60 }
  0x29   :  { %v490_v2 = vmul.u32 2654435761, %v486_v61 }
  0x2a   :  { %v489_v3 = vmul.u32 2654435761, %v485_v62  ;;  %v491_v4 = vmul.u32 2654435761, %v487_v63  ;;  %v494_v5 = vadd.s32 %v493_v1, %v488_v0 }
  0x2b   :  { %v496_v6 = vadd.s32 %v493_v1, %v490_v2 }
  0x2c   :  { %v495_v7 = vadd.s32 %v493_v1, %v489_v3  ;;  %v497_v8 = vadd.s32 %v493_v1, %v491_v4  ;;  %v498_v9 = vshrl.u32 %v494_v5, 16 }
  0x2d   :  { %742 = vmatpush3.bf16.xpose.msra.mxu0 %v282_v35  ;;  %v500_v10 = vshrl.u32 %v496_v6, 16 }
  0x2e   :  { %760 = vmatpush3.bf16.xpose.msra.mxu1 %v330_v37  ;;  %773 = vmatprep.subr.msk.bf16.mxu0 %vm271_vm0, %v808_v36  ;;  %v499_v11 = vshrl.u32 %v495_v7, 16  ;;  %v501_v12 = vshrl.u32 %v497_v8, 16  ;;  %v502_v13 = vxor.u32 %v498_v9, %v494_v5 }
  0x2f   :  { %781 = vmatprep.subr.msk.bf16.mxu1 %vm271_vm0, %v809_v38  ;;  %v504_v14 = vxor.u32 %v500_v10, %v496_v6 }
  0x30   :  { %v503_v15 = vxor.u32 %v499_v11, %v495_v7  ;;  %v505_v16 = vxor.u32 %v501_v12, %v497_v8  ;;  %v506_v17 = vmul.u32 2246822507, %v502_v13 }
  0x31   :  { %v508_v18 = vmul.u32 2246822507, %v504_v14 }
  0x32   :  { %v507_v19 = vmul.u32 2246822507, %v503_v15  ;;  %v509_v20 = vmul.u32 2246822507, %v505_v16  ;;  %v510_v21 = vshrl.u32 %v506_v17, 13 }
  0x33   :  { %v512_v22 = vshrl.u32 %v508_v18, 13 }
  0x34   :  { %v511_v23 = vshrl.u32 %v507_v19, 13  ;;  %v513_v24 = vshrl.u32 %v509_v20, 13  ;;  %v514_v25 = vxor.u32 %v510_v21, %v506_v17 }
  0x35   :  { %744 = vmatpush3.bf16.xpose.msra.mxu0 %v279_v41  ;;  %v516_v27 = vxor.u32 %v512_v22, %v508_v18 }
  0x36   :  { %762 = vmatpush3.bf16.xpose.msra.mxu1 %v327_v43  ;;  %774 = vmatprep.subr.msk.bf16.mxu0 %vm271_vm0, %v812_v42  ;;  %v515_v30 = vxor.u32 %v511_v23, %v507_v19  ;;  %v517_v32 = vxor.u32 %v513_v24, %v509_v20  ;;  %v518_v33 = vmul.u32 3266489909, %v514_v25 }
  0x37   :  { %782 = vmatprep.subr.msk.bf16.mxu1 %vm271_vm0, %v813_v44  ;;  %v520_v36 = vmul.u32 3266489909, %v516_v27 }
  0x38   :  { %v519_v38 = vmul.u32 3266489909, %v515_v30  ;;  %v521_v40 = vmul.u32 3266489909, %v517_v32  ;;  %v522_v42 = vshrl.u32 %v518_v33, 16 }
  0x39   :  { %v524_v46 = vshrl.u32 %v520_v36, 16 }
  0x3a   :  { %v525_v53 = vshrl.u32 %v521_v40, 16  ;;  %v526_v54 = vxor.u32 %v522_v42, %v518_v33  ;;  %v725_v42 = vld [vmem:[%s1056_s5] ss:$0 sm:$0xff]  ;;  %s834_s5 = scalar_lea.vmem %s684_s24, 128 }
  0x3b   :  { %v528_v58 = vxor.u32 %v524_v46, %v520_v36  ;;  %p835_p0 = scmp.ne.s32.totalorder %s684_s24, %s834_s5  ;;  %p840_p2 = scmp.lt.s32.totalorder %s834_s5, %s834_s5 }
  0x3c   :  { %v529_v1 = vxor.u32 %v525_v53, %v521_v40  ;;  %v530_v2 = vshrl.u32 %v526_v54, 8 }
  0x3d   :  { %746 = vmatpush3.bf16.xpose.msra.mxu0 %v276_v47  ;;  %v532_v3 = vshrl.u32 %v528_v58, 8  ;;  %p841_p3 = por %p840_p2, %p839_p1 }
  0x3e   :  { %764 = vmatpush3.bf16.xpose.msra.mxu1 %v324_v48  ;;  %603 = vmatprep.subr.bf16.mxu0 %v818_v49  ;;  %v523_v49 = vshrl.u32 %v519_v38, 16  ;;  %v533_v5 = vshrl.u32 %v529_v1, 8  ;;  %v534_v6 = vcvt.s32.f32 %v530_v2 }
  0x3f   :  { %643 = vmatprep.subr.bf16.mxu1 %v821_v50  ;;  %v536_v7 = vcvt.s32.f32 %v532_v3  ;;  %p842_p4 = pnand %p841_p3, %p835_p0 }
  0x40   :  { %v527_v63 = vxor.u32 %v523_v49, %v519_v38  ;;  %v537_v9 = vcvt.s32.f32 %v533_v5  ;;  %v538_v10 = vmul.f32 5.9604645e-08, %v534_v6 }
  0x41   :  { %v540_v11 = vmul.f32 5.9604645e-08, %v536_v7 }
  0x42   :  { %v531_v4 = vshrl.u32 %v527_v63, 8  ;;  %v541_v17 = vmul.f32 5.9604645e-08, %v537_v9  ;;  %vm542_vm1 = vcmp.ge.f32.partialorder %v538_v10, 0.2 }
  0x43   :  { %vm544_vm2 = vcmp.ge.f32.partialorder %v540_v11, 0.2 }
  0x44   :  { %748 = vmatmul.mubr.msk.bf16.vlgmr.msra.gmra.mxu0 %vm271_vm0, %v24_v28  ;;  %v535_v8 = vcvt.s32.f32 %v531_v4  ;;  %vm545_vm4 = vcmp.ge.f32.partialorder %v541_v17, 0.2 }
  0x45   :  { %766 = vmatmul.mubr.msk.bf16.vlgmr.msra.gmra.mxu1 %vm271_vm0, %v24_v28  ;;  %604 = vmatpush1.bf16.xpose.msra.mxu0 %v816_v51  ;;  %v89_v28 = vld [vmem:[%s1054_s3] sm:$0xf] }
  0x46   :  { %644 = vmatpush1.bf16.xpose.msra.mxu1 %v819_v52  ;;  %v94_v35 = vrot.slane %v89_v28, %v93_v26  ;;  %v102_v37 = vrot.slane %v89_v28, %v101_v29  ;;  %v98_v39 = vrot.slane %v89_v28, %v97_v31  ;;  %v106_v43 = vrot.slane %v89_v28, %v105_v34 }
  0x47   :  { %v539_v13 = vmul.f32 5.9604645e-08, %v535_v8 }
  0x49   :  { %vm543_vm3 = vcmp.ge.f32.partialorder %v539_v13, 0.2 }
 0x104   :  { %v405_v41 = vpop.f32.mrf.mxu0 }
 0x105   :  { %v406_v44 = vadd.f32 %v405_v41, %v94_v35  ;;  %v446_v45 = vpop.f32.mrf.mxu1 }
 0x106   :  { %v447_v47 = vadd.f32 %v446_v45, %v102_v37  ;;  %v407_v48 = vpop.f32.mrf.mxu0 }
 0x107   :  { %v457_v50 = vmul.f32 0.70710677, %v406_v44  ;;  %v408_v51 = vadd.f32 %v407_v48, %v98_v39  ;;  %v448_v52 = vpop.f32.mrf.mxu1  ;;  %v453_v15 = vmul.f32 0.5, %v406_v44 }
 0x108   :  { %v459_v55 = vmul.f32 0.70710677, %v447_v47  ;;  %v449_v56 = vadd.f32 %v448_v52, %v106_v43  ;;  %v409_v57 = vpop.f32.mrf.mxu0  ;;  %v455_v19 = vmul.f32 0.5, %v447_v47 }
 0x109   :  { %822 = verf.f32 %v457_v50  ;;  %v458_v59 = vmul.f32 0.70710677, %v408_v51  ;;  %v450_v60 = vpop.f32.mrf.mxu1  ;;  %v454_v23 = vmul.f32 0.5, %v408_v51 }
 0x10a   :  { %824 = verf.f32 %v459_v55  ;;  %v460_v61 = vmul.f32 0.70710677, %v449_v56  ;;  %v410_v62 = vpop.f32.mrf.mxu0  ;;  %v456_v26 = vmul.f32 0.5, %v449_v56 }
 0x10b   :  { %826 = verf.f32 %v458_v59  ;;  %v451_v0 = vpop.f32.mrf.mxu1 }
 0x10c   :  { %828 = verf.f32 %v460_v61 }
 0x116   :  { %v823_v12 = vpop.eup %822 }
 0x117   :  { %v825_v14 = vpop.eup %824  ;;  %v465_v16 = vadd.f32 1.0, %v823_v12 }
 0x118   :  { %v827_v18 = vpop.eup %826  ;;  %v467_v20 = vadd.f32 1.0, %v825_v14 }
 0x119   :  { %v829_v21 = vpop.eup %828  ;;  %v469_v22 = vmul.f32 %v465_v16, %v453_v15  ;;  %v466_v24 = vadd.f32 1.0, %v827_v18 }
 0x11a   :  { %v471_v25 = vmul.f32 %v467_v20, %v455_v19  ;;  %v468_v27 = vadd.f32 1.0, %v829_v21 }
 0x11b   :  { %v546_v28 = vsel %vm542_vm1, %v469_v22, 0.0  ;;  %v470_v29 = vmul.f32 %v466_v24, %v454_v23 }
 0x11c   :  { %v548_v30 = vsel %vm544_vm2, %v471_v25, 0.0  ;;  %v472_v31 = vmul.f32 %v468_v27, %v456_v26  ;;  %v550_v32 = vmul.f32 1.25, %v546_v28 }
 0x11d   :  { %v547_v33 = vsel %vm543_vm3, %v470_v29, 0.0  ;;  %v552_v34 = vmul.f32 1.25, %v548_v30 }
 0x11e   :  { %v551_v35 = vmul.f32 1.25, %v547_v33  ;;  %v549_v36 = vsel %vm545_vm4, %v472_v31, 0.0  ;;  %v554_v39 = vpack.c.bf16 %v550_v32, %v550_v32 }
 0x11f   :  { %v553_v37 = vmul.f32 1.25, %v549_v36  ;;  %v556_v41 = vpack.c.bf16 %v552_v34, %v552_v34 }
 0x120   :  { %v555_v38 = vpack.c.bf16 %v551_v35, %v551_v35 }
 0x121   :  { %v557_v40 = vpack.c.bf16 %v553_v37, %v553_v37 }
 0x122   :  { %621 = vmatprep.mubr.bf16.mxu0 %v555_v38 }
 0x123   :  { %661 = vmatprep.mubr.bf16.mxu1 %v557_v40  ;;  %622 = vmatmul.mubr.bf16.vlgmr.msra.gmra.mxu0 %v554_v39 }
 0x124   :  { %662 = vmatmul.mubr.bf16.vlgmr.msra.gmra.mxu1 %v556_v41 }
 0x1e3   :  { %v623_v43 = vpop.f32.mrf.mxu0 }
 0x1e4   :  { %v624_v44 = vadd.f32 %v725_v42, %v623_v43  ;;  %v663_v45 = vpop.f32.mrf.mxu1 }
 0x1e5   :  { %v625_v46 = vpop.f32.mrf.mxu0 }
 0x1e6   :  { %v664_v47 = vadd.f32 %v663_v45, %v624_v44  ;;  %v665_v48 = vpop.f32.mrf.mxu1 }
 0x1e7   :  { %v626_v49 = vpop.f32.mrf.mxu0 }
 0x1e8   :  { %v730_v50 = vmul.f32 -1.442695, %v664_v47  ;;  %v666_v51 = vpop.f32.mrf.mxu1 }
 0x1e9   :  { %v627_v52 = vpop.f32.mrf.mxu0 }
 0x1ea   :  { %830 = vpow2.f32 %v730_v50  ;;  %v667_v53 = vpop.f32.mrf.mxu1 }
 0x1f7   :  { %v831_v54 = vpop.eup %830 }
 0x1f8   :  { %v672_v55 = vadd.f32 1.0, %v831_v54 }
 0x1fa   :  { %832 = vrcp.f32 %v672_v55 }
 0x207   :  { %v833_v56 = vpop.eup %832 }
 0x208   :  { %676 = vst.msk [vmem:[#allocation4] sm:$0xff] %vm675_vm5, %v833_v56 }
 0x209   :  { %845 = shalt.err (!%p842_p4)
}
 0x20a   :  { %686 = dma.vmem_to_hbm [thread:$0]  %s684_s24, 128, %s1057_s6, [#allocation5]  }
 0x20b   :  { %854 = dma.done.wait [#allocation5], 128  }
 0x20c   :  { %855 = vsyncadd [#allocation5], 4294967168 }
 0x20d   :  { %690 = vsyncpa [#allocation5], 1 }

</bundles_post_ra>
